<compile_context>
chip_gen: v5e
topology: v5e:2x2
jax: 0.10.0
libtpu: 0.0.40
codegen_flags: <defaults>
</compile_context>

<pallas_src>
import functools

import jax
import jax.numpy as jnp
from jax import lax
from jax.experimental import pallas as pl
from jax.experimental.pallas import tpu as pltpu

QUANTILES = (0.05, 0.5, 0.95)
LANES = 128
TARGET_TILE_BYTES = 2 * 1024 * 1024     # per-input, per-pipeline-buffer tile size
NUM_CORE_SPLITS = 2                     # leading "parallel" axis (v7x has 2 TensorCores)
VMEM_LIMIT_BYTES = 32 * 1024 * 1024
MIN_PALLAS_ELEMENTS = 1 << 20           # below this a fused XLA reduce beats launch overhead


def _pinball_partial_kernel(pred_ref, label_ref, acc_ref, *,
                            rows_valid, tile_rows, tiles_per_split, has_partial):
    """Accumulate per-lane sums of relu(diff) and diff into a (1, 2, 128) resident block."""
    @pl.when(pl.program_id(1) == 0)
    def _init():
        acc_ref[...] = jnp.zeros_like(acc_ref)

    # Cast inside the kernel (free on the VPU); inputs stream in at native dtype.
    diff = pred_ref[...].astype(jnp.float32) - label_ref[...].astype(jnp.float32)

    def _accumulate(d):
        pos = jnp.sum(jnp.maximum(d, 0.0), axis=0, keepdims=True)   # (1, LANES)
        tot = jnp.sum(d, axis=0, keepdims=True)                     # (1, LANES)
        acc_ref[...] += jnp.concatenate([pos, tot], axis=0)[None]   # (1, 2, LANES)

    if not has_partial:
        # Every block is fully valid: pure streaming reduce, no mask anywhere.
        _accumulate(diff)
    else:
        # Only the block(s) that extend past the valid rows pay for the mask.
        step = pl.program_id(0) * tiles_per_split + pl.program_id(1)
        start_row = step * tile_rows
        is_full = start_row + tile_rows <= rows_valid

        @pl.when(is_full)
        def _full():
            _accumulate(diff)

        @pl.when(jnp.logical_not(is_full))
        def _partial():
            # Rows past rows_valid are undefined VMEM (or a clamped duplicate tile);
            # zero them before reducing (0 contributes 0 to both sums).
            row_ids = lax.broadcasted_iota(jnp.int32, diff.shape, 0) + start_row
            _accumulate(jnp.where(row_ids < rows_valid, diff, jnp.float32(0.0)))


@functools.partial(jax.jit, static_argnames=("max_tile_rows",))
def _quantile_loss_pallas(pred, label, *, max_tile_rows=None):
    assert pred.shape == label.shape, "kernel assumes pred/label share a shape"
    n = pred.size

    pred_flat = pred.reshape(-1)
    label_flat = label.reshape(-1)

    rows = n // LANES
    rem = n - rows * LANES
    n_main = rows * LANES

    # <=127-element lane tail handled in plain JAX (no full-array pad copy).
    if rem:
        tail_d = (pred_flat[n_main:].astype(jnp.float32)
                  - label_flat[n_main:].astype(jnp.float32))
        tail_pos = jnp.sum(jnp.maximum(tail_d, 0.0))
        tail_tot = jnp.sum(tail_d)
    else:
        tail_pos = jnp.float32(0.0)
        tail_tot = jnp.float32(0.0)

    if rows == 0:
        s_pos, s_tot = tail_pos, tail_tot
    else:
        itemsize = max(pred.dtype.itemsize, label.dtype.itemsize)
        if max_tile_rows is None:
            max_tile_rows = (TARGET_TILE_BYTES // (LANES * itemsize)) // 8 * 8
        max_tile_rows = max(8, (max_tile_rows // 8) * 8)

        # Full-extent block when small (always legal); otherwise a big 8-aligned tile.
        tile_rows = rows if rows <= max_tile_rows else max_tile_rows
        tiles_total = pl.cdiv(rows, tile_rows)
        num_splits = NUM_CORE_SPLITS if tiles_total >= NUM_CORE_SPLITS else 1
        tiles_per_split = pl.cdiv(tiles_total, num_splits)
        # Masking is needed if the last real tile is partial, or if the rectangular
        # (num_splits, tiles_per_split) grid overhangs tiles_total (clamped steps).
        has_partial = (tiles_total * tile_rows != rows) or \
                      (num_splits * tiles_per_split != tiles_total)

        pred2 = pred_flat[:n_main].reshape(rows, LANES)
        label2 = label_flat[:n_main].reshape(rows, LANES)

        def in_map(c, i):
            # Clamp overhanging logical steps onto the last real tile; their
            # contribution is fully masked out in-kernel, and the repeated block
            # index lets the pipeline skip the redundant DMA.
            return (jnp.minimum(c * tiles_per_split + i, tiles_total - 1), 0)

        kernel = functools.partial(
            _pinball_partial_kernel,
            rows_valid=rows, tile_rows=tile_rows,
            tiles_per_split=tiles_per_split, has_partial=has_partial)

        parts = pl.pallas_call(
            kernel,
            out_shape=jax.ShapeDtypeStruct((num_splits, 2, LANES), jnp.float32),
            grid_spec=pltpu.PrefetchScalarGridSpec(
                num_scalar_prefetch=0,
                grid=(num_splits, tiles_per_split),
                in_specs=[
                    pl.BlockSpec((tile_rows, LANES), in_map),
                    pl.BlockSpec((tile_rows, LANES), in_map),
                ],
                out_specs=pl.BlockSpec((1, 2, LANES), lambda c, i: (c, 0, 0)),
            ),
            compiler_params=pltpu.CompilerParams(
                # axis 0: independent per-split partials -> "parallel" (2 TCs on v7x)
                # axis 1: reduction over tiles -> "arbitrary" (output stays resident)
                dimension_semantics=("parallel", "arbitrary"),
                vmem_limit_bytes=VMEM_LIMIT_BYTES,
            ),
        )(pred2, label2)

        s_pos = jnp.sum(parts[:, 0, :]) + tail_pos
        s_tot = jnp.sum(parts[:, 1, :]) + tail_tot

    # max((q-1)d, qd) = q*relu(d) + (1-q)*relu(-d),  relu(-d) = relu(d) - d.
    s_neg = s_pos - s_tot
    qs = jnp.asarray(QUANTILES, dtype=jnp.float32)
    per_q_mean = (qs * s_pos + (1.0 - qs) * s_neg) / jnp.float32(n)
    return jnp.mean(per_q_mean)


@jax.jit
def _reference(pred, label):
    diff = pred.astype(jnp.float32) - label.astype(jnp.float32)
    losses = [jnp.mean(jnp.maximum((q - 1.0) * diff, q * diff)) for q in QUANTILES]
    return jnp.mean(jnp.stack(losses))


def quantile_loss(pred, label, *, min_pallas_elements=MIN_PALLAS_ELEMENTS,
                  max_tile_rows=None):
    """Pinball loss over quantiles (0.05, 0.5, 0.95), averaged (matches the PyTorch module)."""
    if pred.size < min_pallas_elements:
        # Fixed pallas_call launch/pipeline overhead dominates at tiny sizes.
        return _reference(pred, label)
    return _quantile_loss_pallas(pred, label, max_tile_rows=max_tile_rows)


if __name__ == "__main__":
    key = jax.random.PRNGKey(0)
    k1, k2, k3, k4, k5, k6, k7, k8 = jax.random.split(key, 8)

    # 1) Small shape from the module spec (NCHW-like); force the Pallas path.
    pred = jax.random.normal(k1, (2, 4, 16, 16), dtype=jnp.float32)
    label = jax.random.normal(k2, (2, 4, 16, 16), dtype=jnp.float32)
    loss = quantile_loss(pred, label, min_pallas_elements=0)
    jax.block_until_ready(loss)
    ref = _reference(pred, label)
    assert jnp.allclose(loss, ref, rtol=2e-5, atol=1e-6), (loss, ref)

    # 2) Lane-aligned shape with a forced small tile so the multi-step grid, the
    #    two-way split, the clamped overhang step and the partial-row mask all run.
    pred_b = jax.random.normal(k3, (4, 8, 64, 129), dtype=jnp.float32)
    label_b = jax.random.normal(k4, (4, 8, 64, 129), dtype=jnp.float32)
    loss_b = quantile_loss(pred_b, label_b, min_pallas_elements=0, max_tile_rows=512)
    jax.block_until_ready(loss_b)
    ref_b = _reference(pred_b, label_b)
    assert jnp.allclose(loss_b, ref_b, rtol=2e-5, atol=1e-5), (loss_b, ref_b)

    # 3) Non-lane-aligned bf16 shape (exercises the plain-JAX tail + in-kernel cast).
    pred_o = jax.random.normal(k5, (3, 5, 7, 11), dtype=jnp.bfloat16)
    label_o = jax.random.normal(k6, (3, 5, 7, 11), dtype=jnp.bfloat16)
    loss_o = quantile_loss(pred_o, label_o, min_pallas_elements=0)
    jax.block_until_ready(loss_o)
    ref_o = _reference(pred_o, label_o)
    assert jnp.allclose(loss_o, ref_o, rtol=2e-5, atol=1e-5), (loss_o, ref_o)

    # 4) Default tiling with more rows than one tile: grid (2, 1), split 1 gets the
    #    partial tile (masked last step), split 0 is pure streaming.
    pred_l = jax.random.normal(k7, (4, 4, 256, 130), dtype=jnp.float32)
    label_l = jax.random.normal(k8, (4, 4, 256, 130), dtype=jnp.float32)
    loss_l = quantile_loss(pred_l, label_l, min_pallas_elements=0)
    jax.block_until_ready(loss_l)
    ref_l = _reference(pred_l, label_l)
    assert jnp.allclose(loss_l, ref_l, rtol=2e-5, atol=1e-5), (loss_l, ref_l)

    print("KERNEL_OK")
</pallas_src>

<mosaic_0001>
module attributes {stable_mosaic.version = 11 : i64} {
  func.func @_pinball_partial_kernel(%arg0: i32, %arg1: i32, %arg2: memref<16x128xf32, #tpu.memory_space<vmem>>, %arg3: memref<16x128xf32, #tpu.memory_space<vmem>>, %arg4: memref<1x2x128xf32, #tpu.memory_space<vmem>>) attributes {dimension_semantics = [#tpu.dimension_semantics<parallel>, #tpu.dimension_semantics<arbitrary>], iteration_bounds = array<i64: 1, 1>, scalar_prefetch = 0 : i64, scratch_operands = 0 : i64, tpu.core_type = #tpu.core_type<tc>, window_params = [{transform_indices = @transform_0, window_bounds = array<i64: 16, 128>}, {transform_indices = @transform_1, window_bounds = array<i64: 16, 128>}, {transform_indices = @transform_2, window_bounds = array<i64: 1, 2, 128>}]} {
    %c0_i32 = arith.constant 0 : i32
    %0 = arith.cmpi eq, %arg1, %c0_i32 : i32
    %1 = arith.extui %0 : i1 to i32
    %c0_i32_0 = arith.constant 0 : i32
    %2 = arith.cmpi ne, %1, %c0_i32_0 : i32
    scf.if %2 {
      %cst_12 = arith.constant 0.000000e+00 : f32
      %17 = vector.broadcast %cst_12 : f32 to vector<1x2x128xf32>
      %c0_13 = arith.constant 0 : index
      %c0_14 = arith.constant 0 : index
      %c0_15 = arith.constant 0 : index
      %18 = vector.load %arg4[%c0_13, %c0_14, %c0_15] : memref<1x2x128xf32, #tpu.memory_space<vmem>>, vector<1x2x128xf32>
      tpu.vector_store %arg4[%c0_13, %c0_14, %c0_15], %17 {strides = array<i32>} : memref<1x2x128xf32, #tpu.memory_space<vmem>>, vector<1x2x128xf32>,
    } else {
    }
    %c0 = arith.constant 0 : index
    %c0_1 = arith.constant 0 : index
    %3 = vector.load %arg2[%c0, %c0_1] : memref<16x128xf32, #tpu.memory_space<vmem>>, vector<16x128xf32>
    %c0_2 = arith.constant 0 : index
    %c0_3 = arith.constant 0 : index
    %4 = vector.load %arg3[%c0_2, %c0_3] : memref<16x128xf32, #tpu.memory_space<vmem>>, vector<16x128xf32>
    %5 = arith.subf %3, %4 : vector<16x128xf32>
    %cst = arith.constant 0.000000e+00 : f32
    %6 = vector.broadcast %cst : f32 to vector<16x128xf32>
    %7 = arith.maximumf %5, %6 : vector<16x128xf32>
    %cst_4 = arith.constant dense<0.000000e+00> : vector<128xf32>
    %8 = vector.multi_reduction <add>, %7, %cst_4 [0] : vector<16x128xf32> to vector<128xf32>
    %9 = vector.shape_cast %8 : vector<128xf32> to vector<1x128xf32>
    %cst_5 = arith.constant dense<0.000000e+00> : vector<128xf32>
    %10 = vector.multi_reduction <add>, %5, %cst_5 [0] : vector<16x128xf32> to vector<128xf32>
    %11 = vector.shape_cast %10 : vector<128xf32> to vector<1x128xf32>
    %c0_6 = arith.constant 0 : index
    %c0_7 = arith.constant 0 : index
    %c0_8 = arith.constant 0 : index
    %12 = vector.load %arg4[%c0_6, %c0_7, %c0_8] : memref<1x2x128xf32, #tpu.memory_space<vmem>>, vector<1x2x128xf32>
    %13 = tpu.concatenate %9, %11 in 0 : vector<1x128xf32>, vector<1x128xf32> -> vector<2x128xf32>
    %14 = vector.shape_cast %13 : vector<2x128xf32> to vector<1x2x128xf32>
    %15 = arith.addf %12, %14 : vector<1x2x128xf32>
    %c0_9 = arith.constant 0 : index
    %c0_10 = arith.constant 0 : index
    %c0_11 = arith.constant 0 : index
    %16 = vector.load %arg4[%c0_9, %c0_10, %c0_11] : memref<1x2x128xf32, #tpu.memory_space<vmem>>, vector<1x2x128xf32>
    tpu.vector_store %arg4[%c0_9, %c0_10, %c0_11], %15 {strides = array<i32>} : memref<1x2x128xf32, #tpu.memory_space<vmem>>, vector<1x2x128xf32>,
    return
  }
  func.func @transform_0(%arg0: i32, %arg1: i32) -> (i32, i32) {
    %c1_i32 = arith.constant 1 : i32
    %0 = arith.muli %arg0, %c1_i32 : i32
    %1 = arith.addi %0, %arg1 : i32
    %c0_i32 = arith.constant 0 : i32
    %2 = arith.minsi %1, %c0_i32 : i32
    %c0_i32_0 = arith.constant 0 : i32
    %c0_i32_1 = arith.constant 0 : i32
    return %2, %c0_i32_0 : i32, i32
  }
  func.func @transform_1(%arg0: i32, %arg1: i32) -> (i32, i32) {
    %c1_i32 = arith.constant 1 : i32
    %0 = arith.muli %arg0, %c1_i32 : i32
    %1 = arith.addi %0, %arg1 : i32
    %c0_i32 = arith.constant 0 : i32
    %2 = arith.minsi %1, %c0_i32 : i32
    %c0_i32_0 = arith.constant 0 : i32
    %c0_i32_1 = arith.constant 0 : i32
    return %2, %c0_i32_0 : i32, i32
  }
  func.func @transform_2(%arg0: i32, %arg1: i32) -> (i32, i32, i32) {
    %c0_i32 = arith.constant 0 : i32
    %c0_i32_0 = arith.constant 0 : i32
    %c0_i32_1 = arith.constant 0 : i32
    return %arg0, %c0_i32, %c0_i32_0 : i32, i32, i32
  }
}

</mosaic_0001>

<bundles_post_ra>
// kernel: _quantile_loss_pallas.1
= control target key start
LH: loop header
LB: loop body
LE: loop exit
PB: predicated region body
PF: predicated region fallthrough
CT: control target
= control target key end

     0   :  { %v124_v0 = vmov 0.0   ;;  %vm103_vm0 = vcmask 1040384   ;;  %s161_s2 = inlined_call_operand.vmem [shape: f32[1,2,128], index: 2, kind: output, shape index: {}]   ;;  %s162_s0 = inlined_call_operand.vmem [shape: f32[16,128], index: 0, kind: input, shape index: {}]   ;;  %s163_s1 = inlined_call_operand.vmem [shape: f32[16,128], index: 1, kind: input, shape index: {}]  }
   0x1   :  { %79 = vst [vmem:[%s161_s2] sm:$0x3] %v124_v0  ;;  %v80_v1 = vld [vmem:[%s162_s0] sm:$0xff]  ;;  %v81_v2 = vld [vmem:[%s162_s0 + $0x8] sm:$0xff] }
   0x2   :  { %v82_v3 = vld [vmem:[%s163_s1] sm:$0xff]  ;;  %v83_v4 = vld [vmem:[%s163_s1 + $0x8] sm:$0xff] }
   0x3   :  { %v84_v5 = vsub.f32 %v80_v1, %v82_v3  ;;  %v85_v6 = vsub.f32 %v81_v2, %v83_v4 }
   0x5   :  { %v86_v7 = vmax.f32 %v84_v5, 0.0  ;;  %v87_v8 = vmax.f32 %v85_v6, 0.0  ;;  %v95_v9 = vadd.f32 %v85_v6, %v84_v5 }
   0x7   :  { %v88_v10 = vadd.f32 %v87_v8, %v86_v7  ;;  %v96_v11 = vrot.slane %v95_v9, 4 }
   0x8   :  { %v102_v23 = vld [vmem:[%s161_s2] sm:$0x3] }
   0x9   :  { %v89_v12 = vrot.slane %v88_v10, 4  ;;  %v97_v13 = vadd.f32 %v96_v11, %v95_v9 }
   0xb   :  { %v90_v14 = vadd.f32 %v89_v12, %v88_v10  ;;  %v98_v15 = vrot.slane %v97_v13, 2 }
   0xd   :  { %v91_v16 = vrot.slane %v90_v14, 2  ;;  %v99_v17 = vadd.f32 %v98_v15, %v97_v13 }
   0xf   :  { %v92_v18 = vadd.f32 %v91_v16, %v90_v14  ;;  %v100_v19 = vrot.slane %v99_v17, 1 }
  0x11   :  { %v93_v20 = vrot.slane %v92_v18, 1  ;;  %v101_v21 = vadd.f32 %v100_v19, %v99_v17 }
  0x13   :  { %v94_v22 = vadd.f32 %v93_v20, %v92_v18 }
  0x15   :  { %v104_v24 = vsel %vm103_vm0, %v94_v22, %v101_v21 }
  0x16   :  { %v105_v25 = vadd.f32 %v104_v24, %v102_v23 }
  0x18   :  { %106 = vst [vmem:[%s161_s2] sm:$0x3] %v105_v25 }

</bundles_post_ra>
